<compile_context>
chip_gen: v5e
topology: v5e:2x2
jax: 0.10.0
libtpu: 0.0.40
codegen_flags: <defaults>
</compile_context>

<pallas_src>
import jax
import jax.numpy as jnp
from jax.experimental import pallas as pl
from jax.experimental.pallas import tpu as pltpu


IN_FEATURES = 3

_LANE = 128
_MAX_TILE_N = 64 * 1024       # 64K lanes/step: ~8 MiB double-buffered VMEM, fits v5e default
_SMALL_N_FALLBACK = 512       # below this many rows, XLA einsum beats kernel dispatch


def _make_multilogit_kernel(in_features):
    def kernel(x_ref, w_ref, o_ref):
        # x_ref: (in_features, TILE_N) f32 VMEM   (rows of x on the lane axis)
        # w_ref: (1, in_features)      f32 SMEM   (nn.Linear weight, scalar reads)
        # o_ref: (1, TILE_N)           f32 VMEM   (lane-dense output slab)
        acc = x_ref[0:1, :] * w_ref[0, 0]
        for f in range(1, in_features):
            acc = acc + x_ref[f:f + 1, :] * w_ref[0, f]
        o_ref[...] = acc
    return kernel


def multilogit_forward(x, weight, in_features=IN_FEATURES, *,
                       tile_n=_MAX_TILE_N, min_pallas_rows=_SMALL_N_FALLBACK):
    """Pallas equivalent of MultiLogit.forward.

    x:      float array of shape (..., F) with F >= in_features
    weight: float array of shape (1, in_features) (nn.Linear weight)
    returns array of shape (..., 1)
    """
    x = jnp.asarray(x, dtype=jnp.float32)
    weight = jnp.asarray(weight, dtype=jnp.float32).reshape(1, in_features)

    lead_shape = x.shape[:-1]
    x_sliced = x[..., :in_features]

    n = 1
    for d in lead_shape:
        n *= d

    # Tiny inputs: kernel dispatch + layout plumbing costs more than the op.
    if n < min_pallas_rows:
        return jnp.einsum("...f,of->...o", x_sliced, weight)

    # Rows on the lane axis: (in_features, N). XLA fuses slice+reshape+transpose.
    x_t = x_sliced.reshape(n, in_features).T

    # Pad rows to a full multiple of the lane tile.
    n_pad = pl.cdiv(n, _LANE) * _LANE
    tile = min(tile_n, n_pad)
    tile = pl.cdiv(tile, _LANE) * _LANE
    n_pad = pl.cdiv(n_pad, tile) * tile
    if n_pad != n:
        x_t = jnp.pad(x_t, ((0, 0), (0, n_pad - n)))

    grid = (n_pad // tile,)

    out = pl.pallas_call(
        _make_multilogit_kernel(in_features),
        out_shape=jax.ShapeDtypeStruct((1, n_pad), jnp.float32),
        grid_spec=pltpu.PrefetchScalarGridSpec(
            num_scalar_prefetch=0,
            grid=grid,
            in_specs=[
                # x tile: all features x TILE_N rows (lane-dense, streamed).
                pl.BlockSpec((in_features, tile), lambda i: (0, i)),
                # weight: tiny, resident in SMEM for the whole kernel.
                pl.BlockSpec(memory_space=pltpu.MemorySpace.SMEM),
            ],
            out_specs=pl.BlockSpec((1, tile), lambda i: (0, i)),
        ),
        compiler_params=pltpu.CompilerParams(
            dimension_semantics=("parallel",)),
        cost_estimate=pl.CostEstimate(
            flops=2 * n_pad * in_features,
            transcendentals=0,
            bytes_accessed=n_pad * in_features * 4 + n_pad * 4),
    )(x_t, weight)

    return out[0, :n].reshape(lead_shape + (1,))


if __name__ == "__main__":
    key = jax.random.PRNGKey(0)
    k_x1, k_x2, k_w = jax.random.split(key, 3)

    # Deterministic parameter init matching torch.nn.init.normal_(std=0.01).
    weight = 0.01 * jax.random.normal(k_w, (1, IN_FEATURES), dtype=jnp.float32)

    # Small input (batch=2, seq=8, features=4): exercises the small-N fallback.
    x_small = jax.random.normal(k_x1, (2, 8, 4), dtype=jnp.float32)
    out_small = jax.block_until_ready(multilogit_forward(x_small, weight))
    ref_small = jnp.einsum("...f,of->...o", x_small[..., :IN_FEATURES], weight)
    assert out_small.shape == (2, 8, 1), out_small.shape
    assert jnp.allclose(out_small, ref_small, atol=1e-6), "small-input mismatch"

    # Moderate input (batch=4, seq=1024, features=4): N=4096 rows -> Pallas path.
    x_big = jax.random.normal(k_x2, (4, 1024, 4), dtype=jnp.float32)
    out_big = jax.block_until_ready(multilogit_forward(x_big, weight))
    ref_big = jnp.einsum("...f,of->...o", x_big[..., :IN_FEATURES], weight)
    assert out_big.shape == (4, 1024, 1), out_big.shape
    assert jnp.allclose(out_big, ref_big, atol=1e-6), "pallas mismatch"

    # Same input with a small tile to exercise the multi-step (grid=(4,)) path.
    out_tiled = jax.block_until_ready(
        multilogit_forward(x_big, weight, tile_n=1024))
    assert jnp.allclose(out_tiled, ref_big, atol=1e-6), "tiled-grid mismatch"

    print("KERNEL_OK")
</pallas_src>

<mosaic_0001>
module attributes {stable_mosaic.version = 11 : i64} {
  func.func @kernel(%arg0: i32, %arg1: memref<3x4096xf32, #tpu.memory_space<vmem>>, %arg2: memref<1x3xf32, #tpu.memory_space<smem>>, %arg3: memref<1x4096xf32, #tpu.memory_space<vmem>>) attributes {dimension_semantics = [#tpu.dimension_semantics<parallel>], iteration_bounds = array<i64: 1>, scalar_prefetch = 0 : i64, scratch_operands = 0 : i64, tpu.core_type = #tpu.core_type<tc>, window_params = [{transform_indices = @transform_0, window_bounds = array<i64: 3, 4096>}, {transform_indices = @transform_1, window_bounds = array<i64: 1, 3>}, {transform_indices = @transform_2, window_bounds = array<i64: 1, 4096>}]} {
    %c0 = arith.constant 0 : index
    %c0_0 = arith.constant 0 : index
    %0 = vector.load %arg1[%c0, %c0_0] : memref<3x4096xf32, #tpu.memory_space<vmem>>, vector<1x4096xf32>
    %c0_1 = arith.constant 0 : index
    %c0_2 = arith.constant 0 : index
    %1 = memref.load %arg2[%c0_1, %c0_2] : memref<1x3xf32, #tpu.memory_space<smem>>
    %2 = vector.broadcast %1 : f32 to vector<1x4096xf32>
    %3 = arith.mulf %0, %2 : vector<1x4096xf32>
    %c1 = arith.constant 1 : index
    %c0_3 = arith.constant 0 : index
    %4 = vector.load %arg1[%c1, %c0_3] : memref<3x4096xf32, #tpu.memory_space<vmem>>, vector<1x4096xf32>
    %c0_4 = arith.constant 0 : index
    %c1_5 = arith.constant 1 : index
    %5 = memref.load %arg2[%c0_4, %c1_5] : memref<1x3xf32, #tpu.memory_space<smem>>
    %6 = vector.broadcast %5 : f32 to vector<1x4096xf32>
    %7 = arith.mulf %4, %6 : vector<1x4096xf32>
    %8 = arith.addf %3, %7 : vector<1x4096xf32>
    %c2 = arith.constant 2 : index
    %c0_6 = arith.constant 0 : index
    %9 = vector.load %arg1[%c2, %c0_6] : memref<3x4096xf32, #tpu.memory_space<vmem>>, vector<1x4096xf32>
    %c0_7 = arith.constant 0 : index
    %c2_8 = arith.constant 2 : index
    %10 = memref.load %arg2[%c0_7, %c2_8] : memref<1x3xf32, #tpu.memory_space<smem>>
    %11 = vector.broadcast %10 : f32 to vector<1x4096xf32>
    %12 = arith.mulf %9, %11 : vector<1x4096xf32>
    %13 = arith.addf %8, %12 : vector<1x4096xf32>
    %c0_9 = arith.constant 0 : index
    %c0_10 = arith.constant 0 : index
    %14 = vector.load %arg3[%c0_9, %c0_10] : memref<1x4096xf32, #tpu.memory_space<vmem>>, vector<1x4096xf32>
    tpu.vector_store %arg3[%c0_9, %c0_10], %13 {strides = array<i32>} : memref<1x4096xf32, #tpu.memory_space<vmem>>, vector<1x4096xf32>,
    return
  }
  func.func @transform_0(%arg0: i32) -> (i32, i32) {
    %c0_i32 = arith.constant 0 : i32
    %c0_i32_0 = arith.constant 0 : i32
    return %c0_i32, %arg0 : i32, i32
  }
  func.func @transform_1(%arg0: i32) -> (i32, i32) {
    %c0_i32 = arith.constant 0 : i32
    %c0_i32_0 = arith.constant 0 : i32
    %c0_i32_1 = arith.constant 0 : i32
    return %c0_i32, %c0_i32_0 : i32, i32
  }
  func.func @transform_2(%arg0: i32) -> (i32, i32) {
    %c0_i32 = arith.constant 0 : i32
    %c0_i32_0 = arith.constant 0 : i32
    return %c0_i32, %arg0 : i32, i32
  }
}

</mosaic_0001>

<bundles_post_ra>
// kernel: tpu_custom_call.1
= control target key start
LH: loop header
LB: loop body
LE: loop exit
PB: predicated region body
PF: predicated region fallthrough
CT: control target
= control target key end

     0   :  { %7 = vsyncpa [#allocation3], 0  ;;  %s208_s0 = inlined_call_operand.hbm [shape: f32[3,4096], index: 0, kind: input, shape index: {}]   ;;  %s209_s1 = inlined_call_operand.hbm [shape: f32[1,3], index: 1, kind: input, shape index: {}]   ;;  %s210_s2 = inlined_call_operand.hbm [shape: f32[1,4096], index: 2, kind: output, shape index: {}]  }
   0x1   :  { %8 = vsyncpa [#allocation5], 0 }
   0x2   :  { %9 = vsyncpa [#allocation4], 0  ;;  %s15_s11 = sshll.u32 %s208_s0, 4  ;;  %s181_s12 = smov [#allocation2]   ;;  %s16_s11 = int_to_ptr.hbm [resolvable:$true] %s15_s11 }
   0x3   :  { %s17_s13 = sshll.u32 %s181_s12, 4  ;;  %s26_s16 = sshll.u32 %s209_s1, 4  ;;  %s18_s13 = int_to_ptr.vmem [resolvable:$true] %s17_s13  ;;  %s27_s16 = int_to_ptr.hbm [resolvable:$true] %s26_s16 }
   0x4   :  { %20 = dma.hbm_to_vmem [thread:$0]  %s16_s11, 2048, %s18_s13, [#allocation3]  }
   0x5   :  { %s182_s17 = smov [#allocation6]  }
   0x6   :  { %29 = dma.hbm_to_smem %s27_s16, 16, %s182_s17, [#allocation5]  }
   0x7   :  { %175 = dma.done.wait [#allocation3], 2048  }
   0x8   :  { %176 = vsyncadd [#allocation3], 4294965248 }
   0x9   :  { %177 = dma.done.wait [#allocation5], 16  }
   0xa   :  { %178 = vsyncadd [#allocation5], 4294967280 }
   0xb   :  { %38 = sfence }
   0xc   :  { %s46_s18 = sld [smem:[#allocation6]]  ;;  %v39_v0 = vld [vmem:[#allocation2] ss:$4 sm:$0xff]  ;;  %v53_v1 = vld [vmem:[#allocation2 + $0x1] ss:$4 sm:$0xff]  ;;  %s183_s1 = smov [#allocation7]  }
   0xd   :  { %s110_s19 = sld [smem:[#allocation6 + $0x1]]  ;;  %v41_v2 = vld [vmem:[#allocation2 + $0x20] ss:$4 sm:$0xff]  ;;  %v71_v4 = vld [vmem:[#allocation2 + $0x2] ss:$4 sm:$0xff]  ;;  %s97_s20 = sshll.u32 %s183_s1, 4  ;;  %s98_s20 = int_to_ptr.vmem [resolvable:$true] %s97_s20 }
   0xe   :  { %s111_s0 = sld [smem:[#allocation6 + $0x2]]  ;;  %v43_v3 = vld [vmem:[#allocation2 + $0x40] ss:$4 sm:$0xff]  ;;  %v55_v5 = vld [vmem:[#allocation2 + $0x21] ss:$4 sm:$0xff]  ;;  %s99_s23 = sshll.u32 %s210_s2, 4  ;;  %s100_s23 = int_to_ptr.hbm [resolvable:$true] %s99_s23 }
   0xf   :  { %v57_v6 = vld [vmem:[#allocation2 + $0x41] ss:$4 sm:$0xff]  ;;  %v73_v8 = vld [vmem:[#allocation2 + $0x22] ss:$4 sm:$0xff]  ;;  %v45_v10 = vld [vmem:[#allocation2 + $0x60] ss:$4 sm:$0xff] }
  0x10   :  { %v75_v9 = vld [vmem:[#allocation2 + $0x42] ss:$4 sm:$0xff]  ;;  %v59_v15 = vld [vmem:[#allocation2 + $0x61] ss:$4 sm:$0xff] }
  0x11   :  { %v77_v20 = vld [vmem:[#allocation2 + $0x62] ss:$4 sm:$0xff] }
  0x12   :  { %v47_v7 = vstv %s46_s18 }
  0x13   :  { %v48_v11 = vmul.f32 %v47_v7, %v39_v0  ;;  %v61_v12 = vstv %s110_s19  ;;  %v49_v13 = vmul.f32 %v47_v7, %v41_v2  ;;  %v50_v14 = vmul.f32 %v47_v7, %v43_v3 }
  0x14   :  { %v62_v16 = vmul.f32 %v61_v12, %v53_v1  ;;  %v79_v17 = vstv %s111_s0  ;;  %v63_v18 = vmul.f32 %v61_v12, %v55_v5  ;;  %v64_v19 = vmul.f32 %v61_v12, %v57_v6 }
  0x15   :  { %v80_v21 = vmul.f32 %v79_v17, %v71_v4  ;;  %v81_v22 = vmul.f32 %v79_v17, %v73_v8  ;;  %v82_v23 = vmul.f32 %v79_v17, %v75_v9  ;;  %v51_v24 = vmul.f32 %v47_v7, %v45_v10 }
  0x16   :  { %v66_v25 = vadd.f32 %v62_v16, %v48_v11  ;;  %v67_v26 = vadd.f32 %v63_v18, %v49_v13  ;;  %v68_v27 = vadd.f32 %v64_v19, %v50_v14  ;;  %v65_v28 = vmul.f32 %v61_v12, %v59_v15 }
  0x17   :  { %v83_v29 = vmul.f32 %v79_v17, %v77_v20 }
  0x18   :  { %v84_v30 = vadd.f32 %v80_v21, %v66_v25  ;;  %v85_v31 = vadd.f32 %v81_v22, %v67_v26  ;;  %v86_v32 = vadd.f32 %v82_v23, %v68_v27  ;;  %v69_v33 = vadd.f32 %v65_v28, %v51_v24 }
  0x1a   :  { %88 = vst [vmem:[#allocation7] sm:$0xff] %v84_v30  ;;  %v87_v34 = vadd.f32 %v83_v29, %v69_v33 }
  0x1b   :  { %89 = vst [vmem:[#allocation7 + $0x8] sm:$0xff] %v85_v31 }
  0x1c   :  { %90 = vst [vmem:[#allocation7 + $0x10] sm:$0xff] %v86_v32 }
  0x1d   :  { %91 = vst [vmem:[#allocation7 + $0x18] sm:$0xff] %v87_v34 }
  0x1e   :  { %102 = dma.vmem_to_hbm [thread:$0]  %s98_s20, 512, %s100_s23, [#allocation4]  }
  0x1f   :  { %179 = dma.done.wait [#allocation4], 512  }
  0x20   :  { %180 = vsyncadd [#allocation4], 4294966784 }
  0x21   :  { %107 = vsyncpa [#allocation3], 1 }
  0x22   :  { %108 = vsyncpa [#allocation4], 1 }
  0x23   :  { %109 = vsyncpa [#allocation5], 1 }

</bundles_post_ra>
